<compile_context>
chip_gen: v6e
topology: v6e:2x2x1
jax: 0.10.0
libtpu: 0.0.40
codegen_flags: <defaults>
</compile_context>

<pallas_src>
import jax
import jax.numpy as jnp
from jax.experimental import pallas as pl
from jax.experimental.pallas import tpu as pltpu


def _banded_conv_weights(w, W):
    """Fold the kx taps + channel mixing of a 3x3 HWIO conv into banded matrices.

    w: (3, 3, Cin, Cout)  ->  M: (3, W*Cin, W*Cout) with
        M[ky, xi*Cin + ci, xo*Cout + co] = w[ky, xi - xo + 1, ci, co]  if |xi-xo| <= 1
    so that output row y (laid out as W*Cout lanes) equals
        sum_ky  input_row[y + ky - 1] @ M[ky]
    with the 'same' padding along x handled implicitly by the band structure.
    """
    _, _, c_in, c_out = w.shape
    xi = jnp.arange(W)[:, None, None]
    kx = jnp.arange(3)[None, :, None]
    xo = jnp.arange(W)[None, None, :]
    sel = (xi == xo + kx - 1).astype(w.dtype)           # (W, 3, W)
    m = jnp.einsum("iko,ykcd->yicod", sel, w)           # (3, W, Cin, W, Cout)
    return m.reshape(3, W * c_in, W * c_out)


def _sam_kernel(x_ref, ximg_ref, m12_ref, b12_ref, m3_ref, b3_ref,
                x1_ref, img_ref):
    # x_ref:   (1, H, W*F)        ximg_ref: (1, H, W*C)
    # m12_ref: (3, W*F, W*(F+C))  b12_ref:  (1, W*(F+C))
    # m3_ref:  (3, W*C, W*F)      b3_ref:   (1, W*F)
    H = x_ref.shape[1]
    WF = x_ref.shape[2]

    x = x_ref[0].astype(jnp.float32)                     # (H, W*F)

    def conv_rows(inp, m_ref, b_ref):
        # 3x3 'same' conv as three row-level matmuls + two row-shifted adds.
        t0 = jnp.dot(inp, m_ref[0].astype(jnp.float32),
                     preferred_element_type=jnp.float32)
        t1 = jnp.dot(inp, m_ref[1].astype(jnp.float32),
                     preferred_element_type=jnp.float32)
        t2 = jnp.dot(inp, m_ref[2].astype(jnp.float32),
                     preferred_element_type=jnp.float32)
        zero_row = jnp.zeros((1, t1.shape[-1]), jnp.float32)
        out = t1 + b_ref[...].astype(jnp.float32)
        out = out + jnp.concatenate([zero_row, t0[:H - 1]], axis=0)  # ky=0 tap
        out = out + jnp.concatenate([t2[1:], zero_row], axis=0)      # ky=2 tap
        return out

    # Fused conv1 | conv2: first W*F lanes are conv1(x), rest are conv2(x).
    y12 = conv_rows(x, m12_ref, b12_ref)                  # (H, W*(F+C))
    x1 = y12[:, :WF]                                      # conv1(x)
    img = y12[:, WF:] + ximg_ref[0].astype(jnp.float32)   # conv2(x) + x_img
    img_ref[0] = img.astype(img_ref.dtype)

    # conv3(img) -> sigmoid gate -> residual.
    x2 = jax.nn.sigmoid(conv_rows(img, m3_ref, b3_ref))   # (H, W*F)
    x1_ref[0] = (x1 * x2 + x).astype(x1_ref.dtype)


@jax.jit
def sam_forward(x, x_img, w1, b1, w2, b2, w3, b3):
    """x: (N,H,W,F) NHWC; x_img: (N,H,W,C); weights HWIO; biases (1, out_ch)."""
    N, H, W, F = x.shape
    C = x_img.shape[-1]
    WF, WC = W * F, W * C

    # Host-side weight prep (small, traced once): banded matrices + tiled biases.
    m1 = _banded_conv_weights(w1.astype(jnp.float32), W)      # (3, WF, WF)
    m2 = _banded_conv_weights(w2.astype(jnp.float32), W)      # (3, WF, WC)
    m12 = jnp.concatenate([m1, m2], axis=-1)                  # (3, WF, WF+WC)
    m3 = _banded_conv_weights(w3.astype(jnp.float32), W)      # (3, WC, WF)
    b12 = jnp.concatenate(
        [jnp.tile(b1.reshape(-1), W),
         jnp.tile(b2.reshape(-1), W)])[None, :].astype(jnp.float32)  # (1, WF+WC)
    b3r = jnp.tile(b3.reshape(-1), W)[None, :].astype(jnp.float32)   # (1, WF)

    # Lane-dense activations: fold W and channels into the minor dim.
    x_rows = x.reshape(N, H, WF)
    ximg_rows = x_img.reshape(N, H, WC)

    x1_rows, img_rows = pl.pallas_call(
        _sam_kernel,
        out_shape=(
            jax.ShapeDtypeStruct((N, H, WF), x.dtype),    # x1 (lane-dense)
            jax.ShapeDtypeStruct((N, H, WC), x.dtype),    # img
        ),
        grid=(N,),
        in_specs=[
            pl.BlockSpec((1, H, WF), lambda n: (n, 0, 0)),        # x rows
            pl.BlockSpec((1, H, WC), lambda n: (n, 0, 0)),        # x_img rows
            pl.BlockSpec((3, WF, WF + WC), lambda n: (0, 0, 0)),  # fused w1|w2
            pl.BlockSpec((1, WF + WC), lambda n: (0, 0)),         # fused b1|b2
            pl.BlockSpec((3, WC, WF), lambda n: (0, 0, 0)),       # w3 banded
            pl.BlockSpec((1, WF), lambda n: (0, 0)),              # b3 tiled
        ],
        out_specs=(
            pl.BlockSpec((1, H, WF), lambda n: (n, 0, 0)),
            pl.BlockSpec((1, H, WC), lambda n: (n, 0, 0)),
        ),
        compiler_params=pltpu.CompilerParams(
            dimension_semantics=("parallel",)),
    )(x_rows, ximg_rows, m12, b12, m3, b3r)

    return x1_rows.reshape(N, H, W, F), img_rows.reshape(N, H, W, C)


def _conv_ref(x, w, b):
    y = jax.lax.conv_general_dilated(
        x, w, window_strides=(1, 1), padding="SAME",
        dimension_numbers=("NHWC", "HWIO", "NHWC"))
    return y + b.reshape(1, 1, 1, -1)


def sam_reference(x, x_img, w1, b1, w2, b2, w3, b3):
    x1 = _conv_ref(x, w1, b1)
    img = _conv_ref(x, w2, b2) + x_img
    x2 = jax.nn.sigmoid(_conv_ref(img, w3, b3))
    return x1 * x2 + x, img


if __name__ == "__main__":
    n_feat, inc = 8, 3
    N, H, W = 2, 16, 16

    key = jax.random.PRNGKey(0)
    kx, kimg, k1, k2, k3, k4, k5, k6 = jax.random.split(key, 8)

    x = jax.random.normal(kx, (N, H, W, n_feat), jnp.float32)
    x_img = jax.random.normal(kimg, (N, H, W, inc), jnp.float32)

    # Deterministic synthetic parameters (HWIO weights, (1, out_ch) biases).
    w1 = 0.1 * jax.random.normal(k1, (3, 3, n_feat, n_feat), jnp.float32)
    b1 = 0.1 * jax.random.normal(k2, (1, n_feat), jnp.float32)
    w2 = 0.1 * jax.random.normal(k3, (3, 3, n_feat, inc), jnp.float32)
    b2 = 0.1 * jax.random.normal(k4, (1, inc), jnp.float32)
    w3 = 0.1 * jax.random.normal(k5, (3, 3, inc, n_feat), jnp.float32)
    b3 = 0.1 * jax.random.normal(k6, (1, n_feat), jnp.float32)

    x1, img = sam_forward(x, x_img, w1, b1, w2, b2, w3, b3)
    jax.block_until_ready((x1, img))

    x1_ref, img_ref = sam_reference(x, x_img, w1, b1, w2, b2, w3, b3)
    assert jnp.allclose(x1, x1_ref, atol=1e-4, rtol=1e-4), "x1 mismatch"
    assert jnp.allclose(img, img_ref, atol=1e-4, rtol=1e-4), "img mismatch"

    print("KERNEL_OK")
</pallas_src>

<mosaic_0001>
module attributes {stable_mosaic.version = 11 : i64} {
  func.func @_sam_kernel(%arg0: i32, %arg1: memref<1x16x128xf32, #tpu.memory_space<vmem>>, %arg2: memref<1x16x48xf32, #tpu.memory_space<vmem>>, %arg3: memref<3x128x176xf32, #tpu.memory_space<vmem>>, %arg4: memref<1x176xf32, #tpu.memory_space<vmem>>, %arg5: memref<3x48x128xf32, #tpu.memory_space<vmem>>, %arg6: memref<1x128xf32, #tpu.memory_space<vmem>>, %arg7: memref<1x16x128xf32, #tpu.memory_space<vmem>>, %arg8: memref<1x16x48xf32, #tpu.memory_space<vmem>>) attributes {dimension_semantics = [#tpu.dimension_semantics<parallel>], iteration_bounds = array<i64: 2>, scalar_prefetch = 0 : i64, scratch_operands = 0 : i64, tpu.core_type = #tpu.core_type<tc>, window_params = [{transform_indices = @transform_0, window_bounds = array<i64: 1, 16, 128>}, {transform_indices = @transform_1, window_bounds = array<i64: 1, 16, 48>}, {pipeline_mode = #tpu.pipeline_mode<synchronous>, transform_indices = @transform_2, window_bounds = array<i64: 3, 128, 176>}, {pipeline_mode = #tpu.pipeline_mode<synchronous>, transform_indices = @transform_3, window_bounds = array<i64: 1, 176>}, {pipeline_mode = #tpu.pipeline_mode<synchronous>, transform_indices = @transform_4, window_bounds = array<i64: 3, 48, 128>}, {pipeline_mode = #tpu.pipeline_mode<synchronous>, transform_indices = @transform_5, window_bounds = array<i64: 1, 128>}, {transform_indices = @transform_6, window_bounds = array<i64: 1, 16, 128>}, {transform_indices = @transform_7, window_bounds = array<i64: 1, 16, 48>}]} {
    %c0 = arith.constant 0 : index
    %c0_0 = arith.constant 0 : index
    %c0_1 = arith.constant 0 : index
    %0 = vector.load %arg1[%c0, %c0_0, %c0_1] : memref<1x16x128xf32, #tpu.memory_space<vmem>>, vector<1x16x128xf32>
    %1 = vector.shape_cast %0 : vector<1x16x128xf32> to vector<16x128xf32>
    %c0_2 = arith.constant 0 : index
    %c0_3 = arith.constant 0 : index
    %c0_4 = arith.constant 0 : index
    %2 = vector.load %arg3[%c0_2, %c0_3, %c0_4] : memref<3x128x176xf32, #tpu.memory_space<vmem>>, vector<1x128x176xf32>
    %3 = vector.shape_cast %2 : vector<1x128x176xf32> to vector<128x176xf32>
    %cst = arith.constant dense<0.000000e+00> : vector<16x176xf32>
    %4 = tpu.matmul %1, %3, %cst {dimension_numbers = #tpu.dot_dimension_numbers<[1], [0], [0], [1], [0, 0, 1, 1], [], []>} : vector<16x128xf32>, vector<128x176xf32>, vector<16x176xf32> -> vector<16x176xf32>
    %c1 = arith.constant 1 : index
    %c0_5 = arith.constant 0 : index
    %c0_6 = arith.constant 0 : index
    %5 = vector.load %arg3[%c1, %c0_5, %c0_6] : memref<3x128x176xf32, #tpu.memory_space<vmem>>, vector<1x128x176xf32>
    %6 = vector.shape_cast %5 : vector<1x128x176xf32> to vector<128x176xf32>
    %cst_7 = arith.constant dense<0.000000e+00> : vector<16x176xf32>
    %7 = tpu.matmul %1, %6, %cst_7 {dimension_numbers = #tpu.dot_dimension_numbers<[1], [0], [0], [1], [0, 0, 1, 1], [], []>} : vector<16x128xf32>, vector<128x176xf32>, vector<16x176xf32> -> vector<16x176xf32>
    %c2 = arith.constant 2 : index
    %c0_8 = arith.constant 0 : index
    %c0_9 = arith.constant 0 : index
    %8 = vector.load %arg3[%c2, %c0_8, %c0_9] : memref<3x128x176xf32, #tpu.memory_space<vmem>>, vector<1x128x176xf32>
    %9 = vector.shape_cast %8 : vector<1x128x176xf32> to vector<128x176xf32>
    %cst_10 = arith.constant dense<0.000000e+00> : vector<16x176xf32>
    %10 = tpu.matmul %1, %9, %cst_10 {dimension_numbers = #tpu.dot_dimension_numbers<[1], [0], [0], [1], [0, 0, 1, 1], [], []>} : vector<16x128xf32>, vector<128x176xf32>, vector<16x176xf32> -> vector<16x176xf32>
    %cst_11 = arith.constant 0.000000e+00 : f32
    %11 = vector.broadcast %cst_11 : f32 to vector<1x176xf32>
    %c0_12 = arith.constant 0 : index
    %c0_13 = arith.constant 0 : index
    %12 = vector.load %arg4[%c0_12, %c0_13] : memref<1x176xf32, #tpu.memory_space<vmem>>, vector<1x176xf32>
    %13 = vector.broadcast %12 : vector<1x176xf32> to vector<16x176xf32>
    %14 = arith.addf %7, %13 : vector<16x176xf32>
    %15 = vector.extract_strided_slice %4 {offsets = [0, 0], sizes = [15, 176], strides = [1, 1]} : vector<16x176xf32> to vector<15x176xf32>
    %16 = tpu.concatenate %11, %15 in 0 : vector<1x176xf32>, vector<15x176xf32> -> vector<16x176xf32>
    %17 = arith.addf %14, %16 : vector<16x176xf32>
    %18 = vector.extract_strided_slice %10 {offsets = [1, 0], sizes = [15, 176], strides = [1, 1]} : vector<16x176xf32> to vector<15x176xf32>
    %19 = tpu.concatenate %18, %11 in 0 : vector<15x176xf32>, vector<1x176xf32> -> vector<16x176xf32>
    %20 = arith.addf %17, %19 : vector<16x176xf32>
    %21 = vector.extract_strided_slice %20 {offsets = [0, 0], sizes = [16, 128], strides = [1, 1]} : vector<16x176xf32> to vector<16x128xf32>
    %22 = vector.extract_strided_slice %20 {offsets = [0, 128], sizes = [16, 48], strides = [1, 1]} : vector<16x176xf32> to vector<16x48xf32>
    %c0_14 = arith.constant 0 : index
    %c0_15 = arith.constant 0 : index
    %c0_16 = arith.constant 0 : index
    %23 = vector.load %arg2[%c0_14, %c0_15, %c0_16] : memref<1x16x48xf32, #tpu.memory_space<vmem>>, vector<1x16x48xf32>
    %24 = vector.shape_cast %23 : vector<1x16x48xf32> to vector<16x48xf32>
    %25 = arith.addf %22, %24 : vector<16x48xf32>
    %c0_17 = arith.constant 0 : index
    %c0_18 = arith.constant 0 : index
    %c0_19 = arith.constant 0 : index
    %26 = vector.load %arg8[%c0_17, %c0_18, %c0_19] : memref<1x16x48xf32, #tpu.memory_space<vmem>>, vector<1x16x48xf32>
    %27 = vector.shape_cast %26 : vector<1x16x48xf32> to vector<16x48xf32>
    %28 = vector.shape_cast %25 : vector<16x48xf32> to vector<1x16x48xf32>
    tpu.vector_store %arg8[%c0_17, %c0_18, %c0_19], %28 {strides = array<i32>} : memref<1x16x48xf32, #tpu.memory_space<vmem>>, vector<1x16x48xf32>,
    %c0_20 = arith.constant 0 : index
    %c0_21 = arith.constant 0 : index
    %c0_22 = arith.constant 0 : index
    %29 = vector.load %arg5[%c0_20, %c0_21, %c0_22] : memref<3x48x128xf32, #tpu.memory_space<vmem>>, vector<1x48x128xf32>
    %30 = vector.shape_cast %29 : vector<1x48x128xf32> to vector<48x128xf32>
    %cst_23 = arith.constant dense<0.000000e+00> : vector<16x128xf32>
    %31 = tpu.matmul %25, %30, %cst_23 {dimension_numbers = #tpu.dot_dimension_numbers<[1], [0], [0], [1], [0, 0, 1, 1], [], []>} : vector<16x48xf32>, vector<48x128xf32>, vector<16x128xf32> -> vector<16x128xf32>
    %c1_24 = arith.constant 1 : index
    %c0_25 = arith.constant 0 : index
    %c0_26 = arith.constant 0 : index
    %32 = vector.load %arg5[%c1_24, %c0_25, %c0_26] : memref<3x48x128xf32, #tpu.memory_space<vmem>>, vector<1x48x128xf32>
    %33 = vector.shape_cast %32 : vector<1x48x128xf32> to vector<48x128xf32>
    %cst_27 = arith.constant dense<0.000000e+00> : vector<16x128xf32>
    %34 = tpu.matmul %25, %33, %cst_27 {dimension_numbers = #tpu.dot_dimension_numbers<[1], [0], [0], [1], [0, 0, 1, 1], [], []>} : vector<16x48xf32>, vector<48x128xf32>, vector<16x128xf32> -> vector<16x128xf32>
    %c2_28 = arith.constant 2 : index
    %c0_29 = arith.constant 0 : index
    %c0_30 = arith.constant 0 : index
    %35 = vector.load %arg5[%c2_28, %c0_29, %c0_30] : memref<3x48x128xf32, #tpu.memory_space<vmem>>, vector<1x48x128xf32>
    %36 = vector.shape_cast %35 : vector<1x48x128xf32> to vector<48x128xf32>
    %cst_31 = arith.constant dense<0.000000e+00> : vector<16x128xf32>
    %37 = tpu.matmul %25, %36, %cst_31 {dimension_numbers = #tpu.dot_dimension_numbers<[1], [0], [0], [1], [0, 0, 1, 1], [], []>} : vector<16x48xf32>, vector<48x128xf32>, vector<16x128xf32> -> vector<16x128xf32>
    %cst_32 = arith.constant 0.000000e+00 : f32
    %38 = vector.broadcast %cst_32 : f32 to vector<1x128xf32>
    %c0_33 = arith.constant 0 : index
    %c0_34 = arith.constant 0 : index
    %39 = vector.load %arg6[%c0_33, %c0_34] : memref<1x128xf32, #tpu.memory_space<vmem>>, vector<1x128xf32>
    %40 = vector.broadcast %39 : vector<1x128xf32> to vector<16x128xf32>
    %41 = arith.addf %34, %40 : vector<16x128xf32>
    %42 = vector.extract_strided_slice %31 {offsets = [0, 0], sizes = [15, 128], strides = [1, 1]} : vector<16x128xf32> to vector<15x128xf32>
    %43 = tpu.concatenate %38, %42 in 0 : vector<1x128xf32>, vector<15x128xf32> -> vector<16x128xf32>
    %44 = arith.addf %41, %43 : vector<16x128xf32>
    %45 = vector.extract_strided_slice %37 {offsets = [1, 0], sizes = [15, 128], strides = [1, 1]} : vector<16x128xf32> to vector<15x128xf32>
    %46 = tpu.concatenate %45, %38 in 0 : vector<15x128xf32>, vector<1x128xf32> -> vector<16x128xf32>
    %47 = arith.addf %44, %46 : vector<16x128xf32>
    %48 = arith.negf %47 : vector<16x128xf32>
    %49 = math.exp %48 : vector<16x128xf32>
    %cst_35 = arith.constant 1.000000e+00 : f32
    %50 = vector.broadcast %cst_35 : f32 to vector<16x128xf32>
    %51 = arith.addf %50, %49 : vector<16x128xf32>
    %52 = arith.divf %50, %51 : vector<16x128xf32>
    %53 = arith.mulf %21, %52 : vector<16x128xf32>
    %54 = arith.addf %53, %1 : vector<16x128xf32>
    %c0_36 = arith.constant 0 : index
    %c0_37 = arith.constant 0 : index
    %c0_38 = arith.constant 0 : index
    %55 = vector.load %arg7[%c0_36, %c0_37, %c0_38] : memref<1x16x128xf32, #tpu.memory_space<vmem>>, vector<1x16x128xf32>
    %56 = vector.shape_cast %55 : vector<1x16x128xf32> to vector<16x128xf32>
    %57 = vector.shape_cast %54 : vector<16x128xf32> to vector<1x16x128xf32>
    tpu.vector_store %arg7[%c0_36, %c0_37, %c0_38], %57 {strides = array<i32>} : memref<1x16x128xf32, #tpu.memory_space<vmem>>, vector<1x16x128xf32>,
    return
  }
  func.func @transform_0(%arg0: i32) -> (i32, i32, i32) {
    %c0_i32 = arith.constant 0 : i32
    %c0_i32_0 = arith.constant 0 : i32
    %c0_i32_1 = arith.constant 0 : i32
    return %arg0, %c0_i32, %c0_i32_0 : i32, i32, i32
  }
  func.func @transform_1(%arg0: i32) -> (i32, i32, i32) {
    %c0_i32 = arith.constant 0 : i32
    %c0_i32_0 = arith.constant 0 : i32
    %c0_i32_1 = arith.constant 0 : i32
    return %arg0, %c0_i32, %c0_i32_0 : i32, i32, i32
  }
  func.func @transform_2(%arg0: i32) -> (i32, i32, i32) {
    %c0_i32 = arith.constant 0 : i32
    %c0_i32_0 = arith.constant 0 : i32
    %c0_i32_1 = arith.constant 0 : i32
    %c0_i32_2 = arith.constant 0 : i32
    return %c0_i32, %c0_i32_0, %c0_i32_1 : i32, i32, i32
  }
  func.func @transform_3(%arg0: i32) -> (i32, i32) {
    %c0_i32 = arith.constant 0 : i32
    %c0_i32_0 = arith.constant 0 : i32
    %c0_i32_1 = arith.constant 0 : i32
    return %c0_i32, %c0_i32_0 : i32, i32
  }
  func.func @transform_4(%arg0: i32) -> (i32, i32, i32) {
    %c0_i32 = arith.constant 0 : i32
    %c0_i32_0 = arith.constant 0 : i32
    %c0_i32_1 = arith.constant 0 : i32
    %c0_i32_2 = arith.constant 0 : i32
    return %c0_i32, %c0_i32_0, %c0_i32_1 : i32, i32, i32
  }
  func.func @transform_5(%arg0: i32) -> (i32, i32) {
    %c0_i32 = arith.constant 0 : i32
    %c0_i32_0 = arith.constant 0 : i32
    %c0_i32_1 = arith.constant 0 : i32
    return %c0_i32, %c0_i32_0 : i32, i32
  }
  func.func @transform_6(%arg0: i32) -> (i32, i32, i32) {
    %c0_i32 = arith.constant 0 : i32
    %c0_i32_0 = arith.constant 0 : i32
    %c0_i32_1 = arith.constant 0 : i32
    return %arg0, %c0_i32, %c0_i32_0 : i32, i32, i32
  }
  func.func @transform_7(%arg0: i32) -> (i32, i32, i32) {
    %c0_i32 = arith.constant 0 : i32
    %c0_i32_0 = arith.constant 0 : i32
    %c0_i32_1 = arith.constant 0 : i32
    return %arg0, %c0_i32, %c0_i32_0 : i32, i32, i32
  }
}

</mosaic_0001>

<bundles_post_ra>
// kernel: tile.14
= control target key start
LH: loop header
LB: loop body
LE: loop exit
PB: predicated region body
PF: predicated region fallthrough
CT: control target
= control target key end

     0   :  { %s28_s0 = inlined_call_operand.vmem [shape: f32[8], index: 0, kind: input, shape index: {}]   ;;  %s29_s1 = inlined_call_operand.vmem [shape: f32[16,8], index: 1, kind: output, shape index: {}]  }
   0x1   :  { %v4_v0 = vld [vmem:[%s28_s0] ss:$0 sm:$0xff] }
   0x2   :  { %5 = vst [vmem:[%s29_s1] sm:$0xff] %v4_v0  ;;  %8 = vst [vmem:[%s29_s1 + $0x8] sm:$0xff] %v4_v0 }

// kernel: tile.15
= control target key start
LH: loop header
LB: loop body
LE: loop exit
PB: predicated region body
PF: predicated region fallthrough
CT: control target
= control target key end

     0   :  { %s133_s10 = smov 120   ;;  %s134_s11 = smov 104   ;;  %vm3_vm0 = vcmask 64512   ;;  %vm9_vm1 = vcmask 1048512   ;;  %vm15_vm2 = vcmask 982912   ;;  %vm21_vm3 = vcmask 917312   ;;  %s209_s0 = inlined_call_operand.vmem [shape: f32[16,8], index: 0, kind: input, shape index: {}]   ;;  %s210_s1 = inlined_call_operand.vmem [shape: f32[128], index: 1, kind: output, shape index: {}]  }
   0x1   :  { %v103_v0 = vld [vmem:[%s209_s0 + $0xf] sm:$0x1]   ;;  %v105_v1 = vld [vmem:[%s209_s0 + $0xd] sm:$0x1]   ;;  %v104_v2 = vld [vmem:[%s209_s0 + $0xe] sm:$0x1]  }
   0x2   :  { %7 = vrot.lane.b32.xlu0 %v103_v0, %s133_s10  ;;  %19 = vrot.lane.b32.xlu1 %v105_v1, %s134_s11  ;;  %v106_v3 = vld [vmem:[%s209_s0 + $0xc] sm:$0x1]   ;;  %s135_s16 = smov 112   ;;  %s136_s17 = smov 96   ;;  %v107_v4 = vld [vmem:[%s209_s0 + $0xb] sm:$0x1]  }
   0x3   :  { %v108_v5 = vld [vmem:[%s209_s0 + $0xa] sm:$0x1]   ;;  %v2_v6 = vld [vmem:[%s209_s0] sm:$0x1]   ;;  %s137_s24 = smov 88   ;;  %s138_s25 = smov 80  }
   0x4   :  { %4 = vst.msk [vmem:[#allocation0] sm:$0x1] %vm3_vm0, %v2_v6   ;;  %v109_v7 = vld [vmem:[%s209_s0 + $0x9] sm:$0x1]   ;;  %v110_v8 = vld [vmem:[%s209_s0 + $0x8] sm:$0x1]  }
   0x5   :  { %s139_s30 = smov 72   ;;  %s140_s2 = smov 64   ;;  %v111_v9 = vld [vmem:[%s209_s0 + $0x7] sm:$0x1]   ;;  %v112_v10 = vld [vmem:[%s209_s0 + $0x6] sm:$0x1]  }
   0x6   :  { %13 = vrot.lane.b32.xlu0 %v104_v2, %s135_s16  ;;  %25 = vrot.lane.b32.xlu1 %v106_v3, %s136_s17  ;;  %s141_s7 = smov 56   ;;  %s142_s8 = smov 48   ;;  %v113_v11 = vld [vmem:[%s209_s0 + $0x5] sm:$0x1]   ;;  %v114_v12 = vld [vmem:[%s209_s0 + $0x4] sm:$0x1]  }
   0x7   :  { %s143_s13 = smov 40   ;;  %s144_s14 = smov 32   ;;  %v115_v13 = vld [vmem:[%s209_s0 + $0x3] sm:$0x1]   ;;  %v116_v14 = vld [vmem:[%s209_s0 + $0x2] sm:$0x1]  }
   0x8   :  { %s145_s19 = smov 24   ;;  %s146_s20 = smov 16   ;;  %v117_v15 = vld [vmem:[%s209_s0 + $0x1] sm:$0x1]   ;;  %vm27_vm4 = vcmask 851712   ;;  %vm33_vm5 = vcmask 786112  }
   0x9   :  { %s147_s0 = smov 8   ;;  %vm39_vm6 = vcmask 720512   ;;  %vm45_vm7 = vcmask 654912   ;;  %vm51_vm8 = vcmask 589312   ;;  %vm57_vm9 = vcmask 523712  }
   0xa   :  { %31 = vrot.lane.b32.xlu0 %v107_v4, %s137_s24  ;;  %37 = vrot.lane.b32.xlu1 %v108_v5, %s138_s25  ;;  %vm63_vm10 = vcmask 458112   ;;  %vm69_vm11 = vcmask 392512   ;;  %vm75_vm12 = vcmask 326912   ;;  %vm81_vm13 = vcmask 261312  }
   0xb   :  { %vm87_vm14 = vcmask 195712   ;;  %vm93_vm15 = vcmask 130112  }
   0xe   :  { %43 = vrot.lane.b32.xlu0 %v109_v7, %s139_s30  ;;  %49 = vrot.lane.b32.xlu1 %v110_v8, %s140_s2 }
  0x12   :  { %55 = vrot.lane.b32.xlu0 %v111_v9, %s141_s7  ;;  %61 = vrot.lane.b32.xlu1 %v112_v10, %s142_s8 }
  0x16   :  { %67 = vrot.lane.b32.xlu0 %v113_v11, %s143_s13  ;;  %73 = vrot.lane.b32.xlu1 %v114_v12, %s144_s14 }
  0x1a   :  { %79 = vrot.lane.b32.xlu0 %v115_v13, %s145_s19  ;;  %85 = vrot.lane.b32.xlu1 %v116_v14, %s146_s20 }
  0x1e   :  { %91 = vrot.lane.b32.xlu0 %v117_v15, %s147_s0 }
  0x74   :  { %v8_v16 = vpop.permute.xlu0 %7   ;;  %v20_v17 = vpop.permute.xlu1 %19  }
  0x75   :  { %10 = vst.msk [vmem:[#allocation0] sm:$0x1] %vm9_vm1, %v8_v16  }
  0x78   :  { %v14_v18 = vpop.permute.xlu0 %13   ;;  %v26_v19 = vpop.permute.xlu1 %25  }
  0x79   :  { %16 = vst.msk [vmem:[#allocation0] sm:$0x1] %vm15_vm2, %v14_v18  }
  0x7a   :  { %22 = vst.msk [vmem:[#allocation0] sm:$0x1] %vm21_vm3, %v20_v17  }
  0x7b   :  { %28 = vst.msk [vmem:[#allocation0] sm:$0x1] %vm27_vm4, %v26_v19  }
  0x7c   :  { %v32_v20 = vpop.permute.xlu0 %31   ;;  %v38_v21 = vpop.permute.xlu1 %37  }
  0x7d   :  { %34 = vst.msk [vmem:[#allocation0] sm:$0x1] %vm33_vm5, %v32_v20  }
  0x7e   :  { %40 = vst.msk [vmem:[#allocation0] sm:$0x1] %vm39_vm6, %v38_v21  }
  0x80   :  { %v44_v22 = vpop.permute.xlu0 %43   ;;  %v50_v23 = vpop.permute.xlu1 %49  }
  0x81   :  { %46 = vst.msk [vmem:[#allocation0] sm:$0x1] %vm45_vm7, %v44_v22  }
  0x82   :  { %52 = vst.msk [vmem:[#allocation0] sm:$0x1] %vm51_vm8, %v50_v23  }
  0x84   :  { %v56_v24 = vpop.permute.xlu0 %55   ;;  %v62_v25 = vpop.permute.xlu1 %61  }
  0x85   :  { %58 = vst.msk [vmem:[#allocation0] sm:$0x1] %vm57_vm9, %v56_v24  }
  0x86   :  { %64 = vst.msk [vmem:[#allocation0] sm:$0x1] %vm63_vm10, %v62_v25  }
  0x88   :  { %v68_v26 = vpop.permute.xlu0 %67   ;;  %v74_v27 = vpop.permute.xlu1 %73  }
  0x89   :  { %70 = vst.msk [vmem:[#allocation0] sm:$0x1] %vm69_vm11, %v68_v26  }
  0x8a   :  { %76 = vst.msk [vmem:[#allocation0] sm:$0x1] %vm75_vm12, %v74_v27  }
  0x8c   :  { %v80_v28 = vpop.permute.xlu0 %79   ;;  %v86_v29 = vpop.permute.xlu1 %85  }
  0x8d   :  { %82 = vst.msk [vmem:[#allocation0] sm:$0x1] %vm81_vm13, %v80_v28  }
  0x8e   :  { %88 = vst.msk [vmem:[#allocation0] sm:$0x1] %vm87_vm14, %v86_v29  }
  0x90   :  { %v92_v30 = vpop.permute.xlu0 %91  }
  0x91   :  { %94 = vst.msk [vmem:[#allocation0] sm:$0x1] %vm93_vm15, %v92_v30  }
  0x98   :  { %v99_v31 = vld [vmem:[#allocation0] sm:$0x1] }
  0x99   :  { %102 = vst [vmem:[%s210_s1] sm:$0x1] %v99_v31 }

// kernel: tile.18
= control target key start
LH: loop header
LB: loop body
LE: loop exit
PB: predicated region body
PF: predicated region fallthrough
CT: control target
= control target key end

     0   :  { %s28_s0 = inlined_call_operand.vmem [shape: f32[3], index: 0, kind: input, shape index: {}]   ;;  %s29_s1 = inlined_call_operand.vmem [shape: f32[16,3], index: 1, kind: output, shape index: {}]  }
   0x1   :  { %v4_v0 = vld [vmem:[%s28_s0] ss:$0 sm:$0xff] }
   0x2   :  { %5 = vst [vmem:[%s29_s1] sm:$0xff] %v4_v0  ;;  %8 = vst [vmem:[%s29_s1 + $0x8] sm:$0xff] %v4_v0 }

// kernel: tile.19
= control target key start
LH: loop header
LB: loop body
LE: loop exit
PB: predicated region body
PF: predicated region fallthrough
CT: control target
= control target key end

     0   :  { %s133_s10 = smov 45   ;;  %s134_s11 = smov 39   ;;  %vm3_vm0 = vcmask 23552   ;;  %vm9_vm1 = vcmask 392552   ;;  %vm15_vm2 = vcmask 367952   ;;  %vm21_vm3 = vcmask 343352   ;;  %s209_s0 = inlined_call_operand.vmem [shape: f32[16,3], index: 0, kind: input, shape index: {}]   ;;  %s210_s1 = inlined_call_operand.vmem [shape: f32[48], index: 1, kind: output, shape index: {}]  }
   0x1   :  { %v103_v0 = vld [vmem:[%s209_s0 + $0xf] sm:$0x1]   ;;  %v105_v1 = vld [vmem:[%s209_s0 + $0xd] sm:$0x1]   ;;  %v104_v2 = vld [vmem:[%s209_s0 + $0xe] sm:$0x1]  }
   0x2   :  { %7 = vrot.lane.b32.xlu0 %v103_v0, %s133_s10  ;;  %19 = vrot.lane.b32.xlu1 %v105_v1, %s134_s11  ;;  %v106_v3 = vld [vmem:[%s209_s0 + $0xc] sm:$0x1]   ;;  %s135_s16 = smov 42   ;;  %s136_s17 = smov 36   ;;  %v107_v4 = vld [vmem:[%s209_s0 + $0xb] sm:$0x1]  }
   0x3   :  { %v108_v5 = vld [vmem:[%s209_s0 + $0xa] sm:$0x1]   ;;  %v2_v6 = vld [vmem:[%s209_s0] sm:$0x1]   ;;  %s137_s24 = smov 33   ;;  %s138_s25 = smov 30  }
   0x4   :  { %4 = vst.msk [vmem:[#allocation0] sm:$0x1] %vm3_vm0, %v2_v6   ;;  %v109_v7 = vld [vmem:[%s209_s0 + $0x9] sm:$0x1]   ;;  %v110_v8 = vld [vmem:[%s209_s0 + $0x8] sm:$0x1]  }
   0x5   :  { %s139_s30 = smov 27   ;;  %s140_s2 = smov 24   ;;  %v111_v9 = vld [vmem:[%s209_s0 + $0x7] sm:$0x1]   ;;  %v112_v10 = vld [vmem:[%s209_s0 + $0x6] sm:$0x1]  }
   0x6   :  { %13 = vrot.lane.b32.xlu0 %v104_v2, %s135_s16  ;;  %25 = vrot.lane.b32.xlu1 %v106_v3, %s136_s17  ;;  %s141_s7 = smov 21   ;;  %s142_s8 = smov 18   ;;  %v113_v11 = vld [vmem:[%s209_s0 + $0x5] sm:$0x1]   ;;  %v114_v12 = vld [vmem:[%s209_s0 + $0x4] sm:$0x1]  }
   0x7   :  { %s143_s13 = smov 15   ;;  %s144_s14 = smov 12   ;;  %v115_v13 = vld [vmem:[%s209_s0 + $0x3] sm:$0x1]   ;;  %v116_v14 = vld [vmem:[%s209_s0 + $0x2] sm:$0x1]  }
   0x8   :  { %s145_s19 = smov 9   ;;  %s146_s20 = smov 6   ;;  %v117_v15 = vld [vmem:[%s209_s0 + $0x1] sm:$0x1]   ;;  %vm27_vm4 = vcmask 318752   ;;  %vm33_vm5 = vcmask 294152  }
   0x9   :  { %s147_s0 = smov 3   ;;  %vm39_vm6 = vcmask 269552   ;;  %vm45_vm7 = vcmask 244952   ;;  %vm51_vm8 = vcmask 220352   ;;  %vm57_vm9 = vcmask 195752  }
   0xa   :  { %31 = vrot.lane.b32.xlu0 %v107_v4, %s137_s24  ;;  %37 = vrot.lane.b32.xlu1 %v108_v5, %s138_s25  ;;  %vm63_vm10 = vcmask 171152   ;;  %vm69_vm11 = vcmask 146552   ;;  %vm75_vm12 = vcmask 121952   ;;  %vm81_vm13 = vcmask 97352  }
   0xb   :  { %vm87_vm14 = vcmask 72752   ;;  %vm93_vm15 = vcmask 48152  }
   0xe   :  { %43 = vrot.lane.b32.xlu0 %v109_v7, %s139_s30  ;;  %49 = vrot.lane.b32.xlu1 %v110_v8, %s140_s2 }
  0x12   :  { %55 = vrot.lane.b32.xlu0 %v111_v9, %s141_s7  ;;  %61 = vrot.lane.b32.xlu1 %v112_v10, %s142_s8 }
  0x16   :  { %67 = vrot.lane.b32.xlu0 %v113_v11, %s143_s13  ;;  %73 = vrot.lane.b32.xlu1 %v114_v12, %s144_s14 }
  0x1a   :  { %79 = vrot.lane.b32.xlu0 %v115_v13, %s145_s19  ;;  %85 = vrot.lane.b32.xlu1 %v116_v14, %s146_s20 }
  0x1e   :  { %91 = vrot.lane.b32.xlu0 %v117_v15, %s147_s0 }
  0x74   :  { %v8_v16 = vpop.permute.xlu0 %7   ;;  %v20_v17 = vpop.permute.xlu1 %19  }
  0x75   :  { %10 = vst.msk [vmem:[#allocation0] sm:$0x1] %vm9_vm1, %v8_v16  }
  0x78   :  { %v14_v18 = vpop.permute.xlu0 %13   ;;  %v26_v19 = vpop.permute.xlu1 %25  }
  0x79   :  { %16 = vst.msk [vmem:[#allocation0] sm:$0x1] %vm15_vm2, %v14_v18  }
  0x7a   :  { %22 = vst.msk [vmem:[#allocation0] sm:$0x1] %vm21_vm3, %v20_v17  }
  0x7b   :  { %28 = vst.msk [vmem:[#allocation0] sm:$0x1] %vm27_vm4, %v26_v19  }
  0x7c   :  { %v32_v20 = vpop.permute.xlu0 %31   ;;  %v38_v21 = vpop.permute.xlu1 %37  }
  0x7d   :  { %34 = vst.msk [vmem:[#allocation0] sm:$0x1] %vm33_vm5, %v32_v20  }
  0x7e   :  { %40 = vst.msk [vmem:[#allocation0] sm:$0x1] %vm39_vm6, %v38_v21  }
  0x80   :  { %v44_v22 = vpop.permute.xlu0 %43   ;;  %v50_v23 = vpop.permute.xlu1 %49  }
  0x81   :  { %46 = vst.msk [vmem:[#allocation0] sm:$0x1] %vm45_vm7, %v44_v22  }
  0x82   :  { %52 = vst.msk [vmem:[#allocation0] sm:$0x1] %vm51_vm8, %v50_v23  }
  0x84   :  { %v56_v24 = vpop.permute.xlu0 %55   ;;  %v62_v25 = vpop.permute.xlu1 %61  }
  0x85   :  { %58 = vst.msk [vmem:[#allocation0] sm:$0x1] %vm57_vm9, %v56_v24  }
  0x86   :  { %64 = vst.msk [vmem:[#allocation0] sm:$0x1] %vm63_vm10, %v62_v25  }
  0x88   :  { %v68_v26 = vpop.permute.xlu0 %67   ;;  %v74_v27 = vpop.permute.xlu1 %73  }
  0x89   :  { %70 = vst.msk [vmem:[#allocation0] sm:$0x1] %vm69_vm11, %v68_v26  }
  0x8a   :  { %76 = vst.msk [vmem:[#allocation0] sm:$0x1] %vm75_vm12, %v74_v27  }
  0x8c   :  { %v80_v28 = vpop.permute.xlu0 %79   ;;  %v86_v29 = vpop.permute.xlu1 %85  }
  0x8d   :  { %82 = vst.msk [vmem:[#allocation0] sm:$0x1] %vm81_vm13, %v80_v28  }
  0x8e   :  { %88 = vst.msk [vmem:[#allocation0] sm:$0x1] %vm87_vm14, %v86_v29  }
  0x90   :  { %v92_v30 = vpop.permute.xlu0 %91  }
  0x91   :  { %94 = vst.msk [vmem:[#allocation0] sm:$0x1] %vm93_vm15, %v92_v30  }
  0x98   :  { %v99_v31 = vld [vmem:[#allocation0] sm:$0x1] }
  0x99   :  { %102 = vst [vmem:[%s210_s1] sm:$0x1] %v99_v31 }

// kernel: tile.23
= control target key start
LH: loop header
LB: loop body
LE: loop exit
PB: predicated region body
PF: predicated region fallthrough
CT: control target
= control target key end

     0   :  { %s133_s10 = smov 120   ;;  %s134_s11 = smov 104   ;;  %vm3_vm0 = vcmask 64512   ;;  %vm9_vm1 = vcmask 1048512   ;;  %vm15_vm2 = vcmask 982912   ;;  %vm21_vm3 = vcmask 917312   ;;  %s209_s0 = inlined_call_operand.vmem [shape: f32[16,8], index: 0, kind: input, shape index: {}]   ;;  %s210_s1 = inlined_call_operand.vmem [shape: f32[1,128], index: 1, kind: output, shape index: {}]  }
   0x1   :  { %v103_v0 = vld [vmem:[%s209_s0 + $0xf] sm:$0x1]   ;;  %v105_v1 = vld [vmem:[%s209_s0 + $0xd] sm:$0x1]   ;;  %v104_v2 = vld [vmem:[%s209_s0 + $0xe] sm:$0x1]  }
   0x2   :  { %7 = vrot.lane.b32.xlu0 %v103_v0, %s133_s10  ;;  %19 = vrot.lane.b32.xlu1 %v105_v1, %s134_s11  ;;  %v106_v3 = vld [vmem:[%s209_s0 + $0xc] sm:$0x1]   ;;  %s135_s16 = smov 112   ;;  %s136_s17 = smov 96   ;;  %v107_v4 = vld [vmem:[%s209_s0 + $0xb] sm:$0x1]  }
   0x3   :  { %v108_v5 = vld [vmem:[%s209_s0 + $0xa] sm:$0x1]   ;;  %v2_v6 = vld [vmem:[%s209_s0] sm:$0x1]   ;;  %s137_s24 = smov 88   ;;  %s138_s25 = smov 80  }
   0x4   :  { %4 = vst.msk [vmem:[#allocation0] sm:$0x1] %vm3_vm0, %v2_v6   ;;  %v109_v7 = vld [vmem:[%s209_s0 + $0x9] sm:$0x1]   ;;  %v110_v8 = vld [vmem:[%s209_s0 + $0x8] sm:$0x1]  }
   0x5   :  { %s139_s30 = smov 72   ;;  %s140_s2 = smov 64   ;;  %v111_v9 = vld [vmem:[%s209_s0 + $0x7] sm:$0x1]   ;;  %v112_v10 = vld [vmem:[%s209_s0 + $0x6] sm:$0x1]  }
   0x6   :  { %13 = vrot.lane.b32.xlu0 %v104_v2, %s135_s16  ;;  %25 = vrot.lane.b32.xlu1 %v106_v3, %s136_s17  ;;  %s141_s7 = smov 56   ;;  %s142_s8 = smov 48   ;;  %v113_v11 = vld [vmem:[%s209_s0 + $0x5] sm:$0x1]   ;;  %v114_v12 = vld [vmem:[%s209_s0 + $0x4] sm:$0x1]  }
   0x7   :  { %s143_s13 = smov 40   ;;  %s144_s14 = smov 32   ;;  %v115_v13 = vld [vmem:[%s209_s0 + $0x3] sm:$0x1]   ;;  %v116_v14 = vld [vmem:[%s209_s0 + $0x2] sm:$0x1]  }
   0x8   :  { %s145_s19 = smov 24   ;;  %s146_s20 = smov 16   ;;  %v117_v15 = vld [vmem:[%s209_s0 + $0x1] sm:$0x1]   ;;  %vm27_vm4 = vcmask 851712   ;;  %vm33_vm5 = vcmask 786112  }
   0x9   :  { %s147_s0 = smov 8   ;;  %vm39_vm6 = vcmask 720512   ;;  %vm45_vm7 = vcmask 654912   ;;  %vm51_vm8 = vcmask 589312   ;;  %vm57_vm9 = vcmask 523712  }
   0xa   :  { %31 = vrot.lane.b32.xlu0 %v107_v4, %s137_s24  ;;  %37 = vrot.lane.b32.xlu1 %v108_v5, %s138_s25  ;;  %vm63_vm10 = vcmask 458112   ;;  %vm69_vm11 = vcmask 392512   ;;  %vm75_vm12 = vcmask 326912   ;;  %vm81_vm13 = vcmask 261312  }
   0xb   :  { %vm87_vm14 = vcmask 195712   ;;  %vm93_vm15 = vcmask 130112  }
   0xe   :  { %43 = vrot.lane.b32.xlu0 %v109_v7, %s139_s30  ;;  %49 = vrot.lane.b32.xlu1 %v110_v8, %s140_s2 }
  0x12   :  { %55 = vrot.lane.b32.xlu0 %v111_v9, %s141_s7  ;;  %61 = vrot.lane.b32.xlu1 %v112_v10, %s142_s8 }
  0x16   :  { %67 = vrot.lane.b32.xlu0 %v113_v11, %s143_s13  ;;  %73 = vrot.lane.b32.xlu1 %v114_v12, %s144_s14 }
  0x1a   :  { %79 = vrot.lane.b32.xlu0 %v115_v13, %s145_s19  ;;  %85 = vrot.lane.b32.xlu1 %v116_v14, %s146_s20 }
  0x1e   :  { %91 = vrot.lane.b32.xlu0 %v117_v15, %s147_s0 }
  0x74   :  { %v8_v16 = vpop.permute.xlu0 %7   ;;  %v20_v17 = vpop.permute.xlu1 %19  }
  0x75   :  { %10 = vst.msk [vmem:[#allocation0] sm:$0x1] %vm9_vm1, %v8_v16  }
  0x78   :  { %v14_v18 = vpop.permute.xlu0 %13   ;;  %v26_v19 = vpop.permute.xlu1 %25  }
  0x79   :  { %16 = vst.msk [vmem:[#allocation0] sm:$0x1] %vm15_vm2, %v14_v18  }
  0x7a   :  { %22 = vst.msk [vmem:[#allocation0] sm:$0x1] %vm21_vm3, %v20_v17  }
  0x7b   :  { %28 = vst.msk [vmem:[#allocation0] sm:$0x1] %vm27_vm4, %v26_v19  }
  0x7c   :  { %v32_v20 = vpop.permute.xlu0 %31   ;;  %v38_v21 = vpop.permute.xlu1 %37  }
  0x7d   :  { %34 = vst.msk [vmem:[#allocation0] sm:$0x1] %vm33_vm5, %v32_v20  }
  0x7e   :  { %40 = vst.msk [vmem:[#allocation0] sm:$0x1] %vm39_vm6, %v38_v21  }
  0x80   :  { %v44_v22 = vpop.permute.xlu0 %43   ;;  %v50_v23 = vpop.permute.xlu1 %49  }
  0x81   :  { %46 = vst.msk [vmem:[#allocation0] sm:$0x1] %vm45_vm7, %v44_v22  }
  0x82   :  { %52 = vst.msk [vmem:[#allocation0] sm:$0x1] %vm51_vm8, %v50_v23  }
  0x84   :  { %v56_v24 = vpop.permute.xlu0 %55   ;;  %v62_v25 = vpop.permute.xlu1 %61  }
  0x85   :  { %58 = vst.msk [vmem:[#allocation0] sm:$0x1] %vm57_vm9, %v56_v24  }
  0x86   :  { %64 = vst.msk [vmem:[#allocation0] sm:$0x1] %vm63_vm10, %v62_v25  }
  0x88   :  { %v68_v26 = vpop.permute.xlu0 %67   ;;  %v74_v27 = vpop.permute.xlu1 %73  }
  0x89   :  { %70 = vst.msk [vmem:[#allocation0] sm:$0x1] %vm69_vm11, %v68_v26  }
  0x8a   :  { %76 = vst.msk [vmem:[#allocation0] sm:$0x1] %vm75_vm12, %v74_v27  }
  0x8c   :  { %v80_v28 = vpop.permute.xlu0 %79   ;;  %v86_v29 = vpop.permute.xlu1 %85  }
  0x8d   :  { %82 = vst.msk [vmem:[#allocation0] sm:$0x1] %vm81_vm13, %v80_v28  }
  0x8e   :  { %88 = vst.msk [vmem:[#allocation0] sm:$0x1] %vm87_vm14, %v86_v29  }
  0x90   :  { %v92_v30 = vpop.permute.xlu0 %91  }
  0x91   :  { %94 = vst.msk [vmem:[#allocation0] sm:$0x1] %vm93_vm15, %v92_v30  }
  0x98   :  { %v99_v31 = vld [vmem:[#allocation0] sm:$0x1] }
  0x99   :  { %102 = vst [vmem:[%s210_s1] sm:$0x1] %v99_v31 }

// kernel: sam_forward.1
= control target key start
LH: loop header
LB: loop body
LE: loop exit
PB: predicated region body
PF: predicated region fallthrough
CT: control target
= control target key end

     0   :  { %s1339_s24 = smov 0   ;;  %s1770_s0 = inlined_call_operand.vmem [shape: f32[2,16,128], index: 0, kind: input, shape index: {}]   ;;  %s1771_s1 = inlined_call_operand.vmem [shape: f32[2,16,48], index: 1, kind: input, shape index: {}]   ;;  %s1772_s2 = inlined_call_operand.vmem [shape: f32[3,128,176], index: 2, kind: input, shape index: {}]   ;;  %s1773_s3 = inlined_call_operand.vmem [shape: f32[1,176], index: 3, kind: input, shape index: {}]   ;;  %s1774_s4 = inlined_call_operand.vmem [shape: f32[3,48,128], index: 4, kind: input, shape index: {}]   ;;  %s1775_s5 = inlined_call_operand.vmem [shape: f32[1,128], index: 5, kind: input, shape index: {}]   ;;  %s1776_s6 = inlined_call_operand.vmem [shape: f32[2,16,128], index: 6, kind: output, shape index: {0}]   ;;  %s1777_s7 = inlined_call_operand.vmem [shape: f32[2,16,48], index: 7, kind: output, shape index: {1}]  }
   0x1 LB: > { %s1100_s25 = sadd.s32 4294967295, %s1296_s24   ;;  %p1104_p0 = scmp.ge.s32.totalorder %s1296_s24, 1  ;;  %s1296_s24 = sphi %s1339_s24, %s18_s24  }
   0x2   : > { %p250_p1 = scmp.lt.s32.totalorder %s1296_s24, 3 }
   0x4   : > { %p251_p2 = pnand %p1104_p0, %p250_p1 }
   0x5   : > { %p1435_p3 = scmp.lt.s32.totalorder (!%p251_p2), %s1100_s25, 1 }
   0x6   : > { %254 = sbr.rel (%p251_p2) target bundleno = 545 (0x221), region = 44 }
   0xb   : > { %v345_v0 = vld [vmem:[%s1772_s2 + $0xf8] sm:$0xff]  ;;  %v344_v1 = vld [vmem:[%s1772_s2 + $0xf0] sm:$0xff]  ;;  %v343_v2 = vld [vmem:[%s1772_s2 + $0xe8] sm:$0xff]  ;;  %v1298_v4 = vmov 0.0   ;;  %s1780_s25 = smov (!%p1435_p3, %s1100_s25), 1  ;;  %vm659_vm0 = vcmask 1040384  }
   0xc   : > { %346 = vmatprep.subr.mxu0 %v345_v0  ;;  %v342_v3 = vld [vmem:[%s1772_s2 + $0xe0] sm:$0xff]  ;;  %410 = vmatprep.mubr.f32.mxu0 %v1298_v4  ;;  %v341_v5 = vld [vmem:[%s1772_s2 + $0xd8] sm:$0xff]  ;;  %v340_v6 = vld [vmem:[%s1772_s2 + $0xd0] sm:$0xff]  ;;  %s1491_s8 = sshll.u32 %s1780_s25, 4  ;;  %vm680_vm1 = vcmask 1046528   ;;  %vm701_vm2 = vcmask 392192  }
   0xd   : > { %347 = vmatpush1.msra.mxu0 %v344_v1  ;;  %553 = vmatprep.mubr.f32.mxu1 %v1298_v4  ;;  %v339_v7 = vld [vmem:[%s1772_s2 + $0xc8] sm:$0xff]  ;;  %v338_v8 = vld [vmem:[%s1772_s2 + $0xc0] sm:$0xff]  ;;  %v337_v9 = vld [vmem:[%s1772_s2 + $0xb8] sm:$0xff]  ;;  %s296_s22 = scalar_lea.vmem %s1770_s0, %s1491_s8  ;;  %s301_s9 = scalar_lea.vmem %s1771_s1, %s1491_s8 }
   0xe   : > { %348 = vmatprep.subr.mxu0 %v343_v2  ;;  %v336_v10 = vld [vmem:[%s1772_s2 + $0xb0] sm:$0xff]  ;;  %v335_v11 = vld [vmem:[%s1772_s2 + $0xa8] sm:$0xff]  ;;  %v334_v12 = vld [vmem:[%s1772_s2 + $0xa0] sm:$0xff]  ;;  %s311_s12 = scalar_lea.vmem %s1777_s7, %s1491_s8  ;;  %s306_s16 = scalar_lea.vmem %s1776_s6, %s1491_s8 }
   0xf   : > { %349 = vmatpush1.msra.mxu0 %v342_v3  ;;  %v1176_v13 = vld [vmem:[%s1772_s2 + $0x2f8] sm:$0xff]  ;;  %v1175_v14 = vld [vmem:[%s1772_s2 + $0x2f0] sm:$0xff]  ;;  %v1174_v16 = vld [vmem:[%s1772_s2 + $0x2e8] sm:$0xff] }
  0x10   : > { %350 = vmatprep.subr.mxu0 %v341_v5  ;;  %v333_v15 = vld [vmem:[%s1772_s2 + $0x98] sm:$0xff]  ;;  %489 = vmatprep.subr.mxu1 %v1176_v13  ;;  %v332_v17 = vld [vmem:[%s1772_s2 + $0x90] sm:$0xff]  ;;  %v1173_v18 = vld [vmem:[%s1772_s2 + $0x2e0] sm:$0xff] }
  0x11   : > { %351 = vmatpush1.msra.mxu0 %v340_v6  ;;  %490 = vmatpush1.msra.mxu1 %v1175_v14  ;;  %v1172_v19 = vld [vmem:[%s1772_s2 + $0x2d8] sm:$0xff]  ;;  %v331_v20 = vld [vmem:[%s1772_s2 + $0x88] sm:$0xff]  ;;  %v1171_v21 = vld [vmem:[%s1772_s2 + $0x2d0] sm:$0xff] }
  0x12   : > { %352 = vmatprep.subr.mxu0 %v339_v7  ;;  %491 = vmatprep.subr.mxu1 %v1174_v16  ;;  %v330_v22 = vld [vmem:[%s1772_s2 + $0x80] sm:$0xff]  ;;  %v1170_v23 = vld [vmem:[%s1772_s2 + $0x2c8] sm:$0xff]  ;;  %v329_v24 = vld [vmem:[%s1772_s2 + $0x78] sm:$0xff] }
  0x13   : > { %353 = vmatpush1.msra.mxu0 %v338_v8  ;;  %492 = vmatpush1.msra.mxu1 %v1173_v18  ;;  %v1169_v25 = vld [vmem:[%s1772_s2 + $0x2c0] sm:$0xff]  ;;  %v328_v26 = vld [vmem:[%s1772_s2 + $0x70] sm:$0xff]  ;;  %v1168_v27 = vld [vmem:[%s1772_s2 + $0x2b8] sm:$0xff] }
  0x14   : > { %354 = vmatprep.subr.mxu0 %v337_v9  ;;  %493 = vmatprep.subr.mxu1 %v1172_v19  ;;  %v327_v28 = vld [vmem:[%s1772_s2 + $0x68] sm:$0xff]  ;;  %v1167_v29 = vld [vmem:[%s1772_s2 + $0x2b0] sm:$0xff]  ;;  %v326_v30 = vld [vmem:[%s1772_s2 + $0x60] sm:$0xff] }
  0x15   : > { %355 = vmatpush1.msra.mxu0 %v336_v10  ;;  %494 = vmatpush1.msra.mxu1 %v1171_v21  ;;  %v1166_v31 = vld [vmem:[%s1772_s2 + $0x2a8] sm:$0xff]  ;;  %v325_v32 = vld [vmem:[%s1772_s2 + $0x58] sm:$0xff]  ;;  %v1165_v33 = vld [vmem:[%s1772_s2 + $0x2a0] sm:$0xff] }
  0x16   : > { %356 = vmatprep.subr.mxu0 %v335_v11  ;;  %495 = vmatprep.subr.mxu1 %v1170_v23  ;;  %v324_v34 = vld [vmem:[%s1772_s2 + $0x50] sm:$0xff]  ;;  %v1164_v35 = vld [vmem:[%s1772_s2 + $0x298] sm:$0xff]  ;;  %v323_v36 = vld [vmem:[%s1772_s2 + $0x48] sm:$0xff] }
  0x17   : > { %357 = vmatpush1.msra.mxu0 %v334_v12  ;;  %496 = vmatpush1.msra.mxu1 %v1169_v25  ;;  %v1163_v37 = vld [vmem:[%s1772_s2 + $0x290] sm:$0xff]  ;;  %v322_v38 = vld [vmem:[%s1772_s2 + $0x40] sm:$0xff]  ;;  %v1162_v39 = vld [vmem:[%s1772_s2 + $0x288] sm:$0xff] }
  0x18   : > { %358 = vmatprep.subr.mxu0 %v333_v15  ;;  %497 = vmatprep.subr.mxu1 %v1168_v27  ;;  %v321_v40 = vld [vmem:[%s1772_s2 + $0x38] sm:$0xff]  ;;  %v1161_v41 = vld [vmem:[%s1772_s2 + $0x280] sm:$0xff]  ;;  %v320_v42 = vld [vmem:[%s1772_s2 + $0x30] sm:$0xff] }
  0x19   : > { %359 = vmatpush1.msra.mxu0 %v332_v17  ;;  %498 = vmatpush1.msra.mxu1 %v1167_v29  ;;  %v1160_v43 = vld [vmem:[%s1772_s2 + $0x278] sm:$0xff]  ;;  %v319_v44 = vld [vmem:[%s1772_s2 + $0x28] sm:$0xff]  ;;  %v1159_v45 = vld [vmem:[%s1772_s2 + $0x270] sm:$0xff] }
  0x1a   : > { %360 = vmatprep.subr.mxu0 %v331_v20  ;;  %499 = vmatprep.subr.mxu1 %v1166_v31  ;;  %v318_v46 = vld [vmem:[%s1772_s2 + $0x20] sm:$0xff]  ;;  %v1158_v47 = vld [vmem:[%s1772_s2 + $0x268] sm:$0xff]  ;;  %v317_v48 = vld [vmem:[%s1772_s2 + $0x18] sm:$0xff] }
  0x1b   : > { %361 = vmatpush1.msra.mxu0 %v330_v22  ;;  %500 = vmatpush1.msra.mxu1 %v1165_v33  ;;  %v1157_v49 = vld [vmem:[%s1772_s2 + $0x260] sm:$0xff]  ;;  %v316_v50 = vld [vmem:[%s1772_s2 + $0x10] sm:$0xff]  ;;  %v1156_v51 = vld [vmem:[%s1772_s2 + $0x258] sm:$0xff] }
  0x1c   : > { %362 = vmatprep.subr.mxu0 %v329_v24  ;;  %501 = vmatprep.subr.mxu1 %v1164_v35  ;;  %v315_v52 = vld [vmem:[%s1772_s2 + $0x8] sm:$0xff]  ;;  %v1155_v53 = vld [vmem:[%s1772_s2 + $0x250] sm:$0xff]  ;;  %v314_v54 = vld [vmem:[%s1772_s2] sm:$0xff] }
  0x1d   : > { %363 = vmatpush1.msra.mxu0 %v328_v26  ;;  %502 = vmatpush1.msra.mxu1 %v1163_v37  ;;  %v1154_v55 = vld [vmem:[%s1772_s2 + $0x248] sm:$0xff]  ;;  %v1530_v56 = vld [vmem:[%s296_s22] sm:$0xff]  ;;  %v1144_v57 = vld [vmem:[%s1772_s2 + $0x1f8] sm:$0xff] }
  0x1e   : > { %364 = vmatprep.subr.mxu0 %v327_v28  ;;  %503 = vmatprep.subr.mxu1 %v1162_v39  ;;  %v1143_v58 = vld [vmem:[%s1772_s2 + $0x1f0] sm:$0xff]  ;;  %v1142_v59 = vld [vmem:[%s1772_s2 + $0x1e8] sm:$0xff]  ;;  %v1153_v60 = vld [vmem:[%s1772_s2 + $0x240] sm:$0xff] }
  0x1f   : > { %365 = vmatpush1.msra.mxu0 %v326_v30  ;;  %504 = vmatpush1.msra.mxu1 %v1161_v41  ;;  %v1141_v61 = vld [vmem:[%s1772_s2 + $0x1e0] sm:$0xff]  ;;  %v1152_v62 = vld [vmem:[%s1772_s2 + $0x238] sm:$0xff]  ;;  %v1552_v63 = vld [vmem:[%s296_s22 + $0x8] sm:$0xff] }
  0x20   : > { %366 = vmatprep.subr.mxu0 %v325_v32  ;;  %505 = vmatprep.subr.mxu1 %v1160_v43  ;;  %v1140_v0 = vld [vmem:[%s1772_s2 + $0x1d8] sm:$0xff]  ;;  %v1139_v1 = vld [vmem:[%s1772_s2 + $0x1d0] sm:$0xff]  ;;  %v1138_v3 = vld [vmem:[%s1772_s2 + $0x1c8] sm:$0xff] }
  0x21   : > { %367 = vmatpush1.msra.mxu0 %v324_v34  ;;  %506 = vmatpush1.msra.mxu1 %v1159_v45  ;;  %v1151_v2 = vld [vmem:[%s1772_s2 + $0x230] sm:$0xff]  ;;  %v1150_v5 = vld [vmem:[%s1772_s2 + $0x228] sm:$0xff]  ;;  %v1137_v6 = vld [vmem:[%s1772_s2 + $0x1c0] sm:$0xff] }
  0x22   : > { %368 = vmatprep.subr.mxu0 %v323_v36  ;;  %507 = vmatprep.subr.mxu1 %v1158_v47  ;;  %v1149_v7 = vld [vmem:[%s1772_s2 + $0x220] sm:$0xff]  ;;  %v1136_v8 = vld [vmem:[%s1772_s2 + $0x1b8] sm:$0xff]  ;;  %v1135_v10 = vld [vmem:[%s1772_s2 + $0x1b0] sm:$0xff]  ;;  %v568_v36 = vlaneseq }
  0x23   : > { %369 = vmatpush1.msra.mxu0 %v322_v38  ;;  %508 = vmatpush1.msra.mxu1 %v1157_v49  ;;  %v1148_v9 = vld [vmem:[%s1772_s2 + $0x218] sm:$0xff]  ;;  %v1147_v11 = vld [vmem:[%s1772_s2 + $0x210] sm:$0xff]  ;;  %v1134_v12 = vld [vmem:[%s1772_s2 + $0x1a8] sm:$0xff] }
  0x24   : > { %370 = vmatprep.subr.mxu0 %v321_v40  ;;  %509 = vmatprep.subr.mxu1 %v1156_v51  ;;  %v1146_v13 = vld [vmem:[%s1772_s2 + $0x208] sm:$0xff]  ;;  %v1133_v14 = vld [vmem:[%s1772_s2 + $0x1a0] sm:$0xff]  ;;  %v1132_v16 = vld [vmem:[%s1772_s2 + $0x198] sm:$0xff]  ;;  %v569_v37 = vshrl.u32 %v568_v36, 7 }
  0x25   : > { %371 = vmatpush1.msra.mxu0 %v320_v42  ;;  %510 = vmatpush1.msra.mxu1 %v1155_v53  ;;  %v1145_v15 = vld [vmem:[%s1772_s2 + $0x200] sm:$0xff]  ;;  %v1131_v17 = vld [vmem:[%s1772_s2 + $0x190] sm:$0xff]  ;;  %v1130_v18 = vld [vmem:[%s1772_s2 + $0x188] sm:$0xff] }
  0x26   : > { %372 = vmatprep.subr.mxu0 %v319_v44  ;;  %511 = vmatprep.subr.mxu1 %v1154_v55  ;;  %v1129_v19 = vld [vmem:[%s1772_s2 + $0x180] sm:$0xff]  ;;  %v1128_v20 = vld [vmem:[%s1772_s2 + $0x178] sm:$0xff]  ;;  %v1127_v21 = vld [vmem:[%s1772_s2 + $0x170] sm:$0xff]  ;;  %v570_v39 = vsub.s32 0, %v569_v37 }
  0x27   : > { %373 = vmatpush1.msra.mxu0 %v318_v46  ;;  %512 = vmatpush1.msra.mxu1 %v1153_v60  ;;  %v1126_v22 = vld [vmem:[%s1772_s2 + $0x168] sm:$0xff]  ;;  %v1125_v23 = vld [vmem:[%s1772_s2 + $0x160] sm:$0xff]  ;;  %v1124_v24 = vld [vmem:[%s1772_s2 + $0x158] sm:$0xff]  ;;  %v574_v60 = vsub.s32 1, %v569_v37 }
  0x28   : > { %374 = vmatprep.subr.mxu0 %v317_v48  ;;  %513 = vmatprep.subr.mxu1 %v1152_v62  ;;  %v1123_v25 = vld [vmem:[%s1772_s2 + $0x150] sm:$0xff]  ;;  %v1122_v26 = vld [vmem:[%s1772_s2 + $0x148] sm:$0xff]  ;;  %v1121_v27 = vld [vmem:[%s1772_s2 + $0x140] sm:$0xff] }
  0x29   : > { %375 = vmatpush1.msra.mxu0 %v316_v50  ;;  %514 = vmatpush1.msra.mxu1 %v1151_v2  ;;  %v1120_v28 = vld [vmem:[%s1772_s2 + $0x138] sm:$0xff]  ;;  %v1119_v29 = vld [vmem:[%s1772_s2 + $0x130] sm:$0xff]  ;;  %v1118_v30 = vld [vmem:[%s1772_s2 + $0x128] sm:$0xff] }
  0x2a   : > { %376 = vmatprep.subr.mxu0 %v315_v52  ;;  %515 = vmatprep.subr.mxu1 %v1150_v5  ;;  %v1117_v31 = vld [vmem:[%s1772_s2 + $0x120] sm:$0xff]  ;;  %v1116_v32 = vld [vmem:[%s1772_s2 + $0x118] sm:$0xff]  ;;  %v1115_v33 = vld [vmem:[%s1772_s2 + $0x110] sm:$0xff] }
  0x2b   : > { %377 = vmatpush1.msra.mxu0 %v314_v54  ;;  %516 = vmatpush1.msra.mxu1 %v1149_v7  ;;  %v1114_v34 = vld [vmem:[%s1772_s2 + $0x108] sm:$0xff]  ;;  %v1113_v35 = vld [vmem:[%s1772_s2 + $0x100] sm:$0xff]  ;;  %v707_v42 = vld [vmem:[%s1774_s4 + $0x18] sm:$0xff] }
  0x2c   : > { %411 = vmatmul.mubr.f32.vlgmr.msra.gmra.mxu0 %v1530_v56  ;;  %578 = vmatprep.subr.mxu0 %v1144_v57  ;;  %v566_v38 = vld [vmem:[%s1773_s3] sm:$0x3]  ;;  %v709_v41 = vld [vmem:[%s1774_s4 + $0x28] sm:$0xff]  ;;  %v706_v43 = vld [vmem:[%s1774_s4 + $0x10] sm:$0xff] }
  0x2d   : > { %579 = vmatpush1.msra.mxu0 %v1143_v58  ;;  %416 = vmatprep.mubr.f32.mxu0 %v1298_v4  ;;  %v571_v40 = vrot.slane %v566_v38, %v570_v39  ;;  %v705_v44 = vld [vmem:[%s1774_s4 + $0x8] sm:$0xff]  ;;  %v704_v45 = vld [vmem:[%s1774_s4] sm:$0xff]  ;;  %v1184_v37 = vld [vmem:[%s1774_s4 + $0x58] sm:$0xff] }
  0x2e   : > { %580 = vmatprep.subr.mxu0 %v1142_v59  ;;  %517 = vmatprep.subr.mxu1 %v1148_v9  ;;  %v1190_v46 = vld [vmem:[%s1774_s4 + $0x88] sm:$0xff]  ;;  %v1185_v36 = vld [vmem:[%s1774_s4 + $0x60] sm:$0xff] }
  0x2f   : > { %581 = vmatpush1.msra.mxu0 %v1141_v61  ;;  %518 = vmatpush1.msra.mxu1 %v1147_v11  ;;  %v1182_v39 = vld [vmem:[%s1774_s4 + $0x48] sm:$0xff] }
  0x30   : > { %417 = vmatmul.mubr.f32.gmra.mxu0 %v1552_v63  ;;  %582 = vmatprep.subr.mxu0 %v1140_v0  ;;  %v575_v0 = vrot.slane %v566_v38, %v574_v60  ;;  %v1183_v38 = vld [vmem:[%s1774_s4 + $0x50] sm:$0xff] }
  0x31   : > { %583 = vmatpush1.msra.mxu0 %v1139_v1  ;;  %519 = vmatprep.subr.mxu1 %v1146_v13 }
  0x32   : > { %584 = vmatprep.subr.mxu0 %v1138_v3  ;;  %520 = vmatpush1.msra.mxu1 %v1145_v15 }
  0x33   : > { %585 = vmatpush1.msra.mxu0 %v1137_v6  ;;  %554 = vmatmul.mubr.f32.vlgmr.msra.gmra.mxu1 %v1530_v56 }
  0x34   : > { %586 = vmatprep.subr.mxu0 %v1136_v8  ;;  %559 = vmatprep.mubr.f32.mxu1 %v1298_v4 }
  0x35   : > { %587 = vmatpush1.msra.mxu0 %v1135_v10  ;;  %642 = vmatprep.mubr.f32.mxu0 %v1298_v4 }
  0x36   : > { %588 = vmatprep.subr.mxu0 %v1134_v12  ;;  %1228 = vmatprep.subr.mxu1 %v709_v41 }
  0x37   : > { %589 = vmatpush1.msra.mxu0 %v1133_v14  ;;  %560 = vmatmul.mubr.f32.gmra.mxu1 %v1552_v63 }
  0x38   : > { %590 = vmatprep.subr.mxu0 %v1132_v16  ;;  %1229 = vmatpush3.msra.mxu1 %v709_v41  ;;  %v1180_v41 = vld [vmem:[%s1774_s4 + $0x38] sm:$0xff] }
  0x39   : > { %591 = vmatpush1.msra.mxu0 %v1131_v17 }
  0x3a   : > { %592 = vmatprep.subr.mxu0 %v1130_v18 }
  0x3b   : > { %593 = vmatpush1.msra.mxu0 %v1129_v19  ;;  %v697_v19 = vld [vmem:[%s301_s9] sm:$0xff] }
  0x3c   : > { %594 = vmatprep.subr.mxu0 %v1128_v20 }
  0x3d   : > { %595 = vmatpush1.msra.mxu0 %v1127_v21 }
  0x3e   : > { %596 = vmatprep.subr.mxu0 %v1126_v22 }
  0x3f   : > { %597 = vmatpush1.msra.mxu0 %v1125_v23 }
  0x40   : > { %598 = vmatprep.subr.mxu0 %v1124_v24 }
  0x41   : > { %599 = vmatpush1.msra.mxu0 %v1123_v25 }
  0x42   : > { %600 = vmatprep.subr.mxu0 %v1122_v26 }
  0x43   : > { %601 = vmatpush1.msra.mxu0 %v1121_v27 }
  0x44   : > { %602 = vmatprep.subr.mxu0 %v1120_v28 }
  0x45   : > { %603 = vmatpush1.msra.mxu0 %v1119_v29  ;;  %v698_v29 = vld [vmem:[%s301_s9 + $0x8] sm:$0xff] }
  0x46   : > { %604 = vmatprep.subr.mxu0 %v1118_v30 }
  0x47   : > { %605 = vmatpush1.msra.mxu0 %v1117_v31 }
  0x48   : > { %606 = vmatprep.subr.mxu0 %v1116_v32  ;;  %v1189_v32 = vld [vmem:[%s1774_s4 + $0x80] sm:$0xff] }
  0x49   : > { %607 = vmatpush1.msra.mxu0 %v1115_v33  ;;  %v1188_v33 = vld [vmem:[%s1774_s4 + $0x78] sm:$0xff] }
  0x4a   : > { %608 = vmatprep.subr.mxu0 %v1114_v34  ;;  %v1187_v34 = vld [vmem:[%s1774_s4 + $0x70] sm:$0xff] }
  0x4b   : > { %609 = vmatpush1.msra.mxu0 %v1113_v35  ;;  %v1186_v35 = vld [vmem:[%s1774_s4 + $0x68] sm:$0xff] }
  0x4c   : > { %643 = vmatmul.mubr.f32.vlgmr.msra.gmra.mxu0 %v1530_v56 }
  0x4d   : > { %648 = vmatprep.mubr.f32.mxu0 %v1298_v4  ;;  %v708_v4 = vld [vmem:[%s1774_s4 + $0x20] sm:$0xff] }
  0x4e   : > { %1230 = vmatprep.subr.mxu1 %v708_v4 }
  0x4f   : > { %1231 = vmatpush3.msra.mxu1 %v708_v4  ;;  %v1179_v4 = vld [vmem:[%s1774_s4 + $0x30] sm:$0xff] }
  0x50   : > { %649 = vmatmul.mubr.f32.gmra.mxu0 %v1552_v63  ;;  %1232 = vmatprep.subr.mxu1 %v707_v42 }
  0x51   : > { %1233 = vmatpush3.msra.mxu1 %v707_v42 }
  0x52   : > { %1234 = vmatprep.subr.mxu1 %v706_v43 }
  0x53   : > { %1235 = vmatpush3.msra.mxu1 %v706_v43 }
  0x54   : > { %1236 = vmatprep.subr.mxu1 %v705_v44 }
  0x55   : > { %1237 = vmatpush3.msra.mxu1 %v705_v44 }
  0x56   : > { %1238 = vmatprep.subr.mxu1 %v704_v45 }
  0x57   : > { %1239 = vmatpush3.msra.mxu1 %v704_v45 }
  0x58   : > { %1243 = vmatprep.subr.mxu1 %v1190_v46 }
  0xec   : > { %v412_v47 = vpop.f32.mrf.mxu0 }
  0xed   : > { %v660_v50 = vrot.slane %v412_v47, 7  ;;  %v1193_v47 = vld [vmem:[%s1775_s5] ss:$0 sm:$0xff] }
  0xee   : > { %v414_v48 = vpop.f32.mrf.mxu0 }
  0xef   : > { %v661_v1 = vrot.slane %v414_v48, 7  ;;  %v670_v5 = vsel %vm659_vm0, 0.0, %v660_v50 }
  0xf0   : > { %v418_v49 = vpop.f32.mrf.mxu0 }
  0xf1   : > { %v662_v51 = vrot.slane %v418_v49, 7  ;;  %v671_v11 = vsel %vm659_vm0, 0.0, %v661_v1 }
  0xf2   : > { %v420_v61 = vpop.f32.mrf.mxu0 }
  0xf3   : > { %v663_v52 = vsel %vm659_vm0, %v660_v50, %v662_v51  ;;  %v555_v53 = vpop.f32.mrf.mxu1  ;;  %v664_v12 = vrot.slane %v420_v61, 7 }
  0xf4   : > { %v681_v55 = vrot.slane %v555_v53, 1 }
  0xf5   : > { %v557_v54 = vpop.f32.mrf.mxu1  ;;  %v665_v24 = vsel %vm659_vm0, %v661_v1, %v664_v12 }
  0xf6   : > { %v684_v6 = vrot.slane %v557_v54, 1 }
  0xf7   : > { %v561_v57 = vpop.f32.mrf.mxu1 }
  0xf8   : > { %v682_v58 = vrot.slane %v561_v57, 1 }
  0xf9   : > { %v563_v62 = vpop.f32.mrf.mxu1 }
  0xfa   : > { %v683_v59 = vsel %vm680_vm1, %v681_v55, %v682_v58  ;;  %v685_v7 = vrot.slane %v563_v62, 1  ;;  %v691_v17 = vsel %vm680_vm1, %v682_v58, 0.0 }
  0xfc   : > { %v686_v18 = vsel %vm680_vm1, %v684_v6, %v685_v7  ;;  %v692_v28 = vsel %vm680_vm1, %v685_v7, 0.0 }
 0x10c   : > { %v644_v2 = vpop.f32.mrf.mxu0 }
 0x10d   : > { %v645_v3 = vadd.f32 %v644_v2, %v571_v40 }
 0x10e   : > { %v646_v8 = vpop.f32.mrf.mxu0 }
 0x10f   : > { %v672_v9 = vadd.f32 %v670_v5, %v645_v3  ;;  %v647_v10 = vadd.f32 %v646_v8, %v575_v0 }
 0x110   : > { %v650_v13 = vpop.f32.mrf.mxu0 }
 0x111   : > { %v1699_v14 = vadd.f32 %v683_v59, %v672_v9  ;;  %v673_v15 = vadd.f32 %v671_v11, %v647_v10  ;;  %v651_v16 = vadd.f32 %v650_v13, %v571_v40  ;;  %v1181_v40 = vld [vmem:[%s1774_s4 + $0x40] sm:$0xff] }
 0x112   : > { %v652_v20 = vpop.f32.mrf.mxu0 }
 0x113   : > { %v694_v21 = vadd.f32 %v686_v18, %v673_v15  ;;  %v674_v22 = vadd.f32 %v663_v52, %v651_v16  ;;  %v653_v23 = vadd.f32 %v652_v20, %v575_v0 }
 0x115   : > { %v699_v25 = vadd.f32 %v697_v19, %v694_v21  ;;  %v1708_v26 = vadd.f32 %v691_v17, %v674_v22  ;;  %v675_v27 = vadd.f32 %v665_v24, %v653_v23 }
 0x117   : > { %702 = vst.msk [vmem:[%s311_s12] sm:$0xff] %vm701_vm2, %v699_v25  ;;  %v696_v30 = vadd.f32 %v692_v28, %v675_v27  ;;  %1240 = vmatprep.mubr.msk.f32.mxu1 %vm701_vm2, %v699_v25 }
 0x119   : > { %v700_v31 = vadd.f32 %v698_v29, %v696_v30 }
 0x11b   : > { %703 = vst.msk [vmem:[%s311_s12 + $0x8] sm:$0xff] %vm701_vm2, %v700_v31  ;;  %1241 = vmatmul.mubr.msk.f32.vlgmr.msra.gmra.mxu1 %vm701_vm2, %v700_v31 }
 0x11c   : > { %1244 = vmatpush3.msra.mxu1 %v1190_v46  ;;  %1255 = vmatprep.mubr.msk.f32.mxu1 %vm701_vm2, %v699_v25 }
 0x11d   : > { %1245 = vmatprep.subr.mxu1 %v1189_v32 }
 0x11e   : > { %1246 = vmatpush3.msra.mxu1 %v1189_v32 }
 0x11f   : > { %1247 = vmatprep.subr.mxu1 %v1188_v33 }
 0x120   : > { %1248 = vmatpush3.msra.mxu1 %v1188_v33 }
 0x121   : > { %1249 = vmatprep.subr.mxu1 %v1187_v34 }
 0x122   : > { %1250 = vmatpush3.msra.mxu1 %v1187_v34 }
 0x123   : > { %1251 = vmatprep.subr.mxu1 %v1186_v35 }
 0x124   : > { %1252 = vmatpush3.msra.mxu1 %v1186_v35 }
 0x125   : > { %1253 = vmatprep.subr.mxu1 %v1185_v36 }
 0x126   : > { %1254 = vmatpush3.msra.mxu1 %v1185_v36 }
 0x127   : > { %1256 = vmatmul.mubr.msk.f32.vlgmr.msra.gmra.mxu1 %vm701_vm2, %v700_v31  ;;  %1258 = vmatprep.subr.mxu1 %v1184_v37 }
 0x128   : > { %1259 = vmatpush3.msra.mxu1 %v1184_v37  ;;  %1270 = vmatprep.mubr.msk.f32.mxu1 %vm701_vm2, %v699_v25 }
 0x129   : > { %1260 = vmatprep.subr.mxu1 %v1183_v38 }
 0x12a   : > { %1261 = vmatpush3.msra.mxu1 %v1183_v38 }
 0x12b   : > { %1262 = vmatprep.subr.mxu1 %v1182_v39 }
 0x12c   : > { %1263 = vmatpush3.msra.mxu1 %v1182_v39 }
 0x12d   : > { %1264 = vmatprep.subr.mxu1 %v1181_v40 }
 0x12e   : > { %1265 = vmatpush3.msra.mxu1 %v1181_v40 }
 0x12f   : > { %1266 = vmatprep.subr.mxu1 %v1180_v41 }
 0x130   : > { %1267 = vmatpush3.msra.mxu1 %v1180_v41 }
 0x131   : > { %1268 = vmatprep.subr.mxu1 %v1179_v4 }
 0x132   : > { %1269 = vmatpush3.msra.mxu1 %v1179_v4 }
 0x133   : > { %1271 = vmatmul.mubr.msk.f32.vlgmr.msra.gmra.mxu1 %vm701_vm2, %v700_v31 }
 0x1db   : > { %v1242_v42 = vpop.f32.mrf.mxu1 }
 0x1dc   : > { %v965_v48 = vrot.slane %v1242_v42, 7 }
 0x1dd   : > { %v782_v43 = vpop.f32.mrf.mxu1 }
 0x1de   : > { %v964_v45 = vrot.slane %v782_v43, 7 }
 0x1e0   : > { %v966_v53 = vsel %vm659_vm0, %v964_v45, %v965_v48  ;;  %v969_v58 = vsel %vm659_vm0, 0.0, %v964_v45 }
 0x1e7   : > { %v1257_v44 = vpop.f32.mrf.mxu1 }
 0x1e8   : > { %v975_v49 = vrot.slane %v1257_v44, 1 }
 0x1e9   : > { %v871_v46 = vpop.f32.mrf.mxu1 }
 0x1ea   : > { %v974_v52 = vrot.slane %v871_v46, 1  ;;  %v979_v59 = vsel %vm680_vm1, %v975_v49, 0.0 }
 0x1ec   : > { %v976_v62 = vsel %vm680_vm1, %v974_v52, %v975_v49 }
 0x1f3   : > { %v1272_v50 = vpop.f32.mrf.mxu1 }
 0x1f4   : > { %v959_v51 = vadd.f32 %v1272_v50, %v1193_v47 }
 0x1f5   : > { %v953_v54 = vpop.f32.mrf.mxu1 }
 0x1f6   : > { %v971_v55 = vadd.f32 %v966_v53, %v959_v51  ;;  %v954_v57 = vadd.f32 %v1193_v47, %v953_v54 }
 0x1f8   : > { %v981_v60 = vadd.f32 %v979_v59, %v971_v55  ;;  %v970_v61 = vadd.f32 %v969_v58, %v954_v57 }
 0x1fa   : > { %v1197_v0 = vmul.f32 -1.442695, %v981_v60  ;;  %v980_v1 = vadd.f32 %v976_v62, %v970_v61 }
 0x1fc   : > { %1282 = vpow2.f32 %v1197_v0  ;;  %v1196_v2 = vmul.f32 -1.442695, %v980_v1 }
 0x1fe   : > { %1284 = vpow2.f32 %v1196_v2 }
 0x209   : > { %v1283_v3 = vpop.eup %1282 }
 0x20a   : > { %v989_v5 = vadd.f32 1.0, %v1283_v3 }
 0x20b   : > { %v1285_v6 = vpop.eup %1284 }
 0x20c   : > { %1286 = vrcp.f32 %v989_v5  ;;  %v988_v7 = vadd.f32 1.0, %v1285_v6 }
 0x20e   : > { %1288 = vrcp.f32 %v988_v7 }
 0x219   : > { %v1287_v8 = vpop.eup %1286 }
 0x21a   : > { %v995_v9 = vmul.f32 %v1287_v8, %v1708_v26 }
 0x21b   : > { %v1289_v10 = vpop.eup %1288 }
 0x21c   : > { %v997_v11 = vadd.f32 %v995_v9, %v1552_v63  ;;  %v994_v12 = vmul.f32 %v1289_v10, %v1699_v14 }
 0x21e   : > { %999 = vst [vmem:[%s306_s16 + $0x8] sm:$0xff] %v997_v11  ;;  %v996_v13 = vadd.f32 %v994_v12, %v1530_v56 }
 0x220   : > { %998 = vst [vmem:[%s306_s16] sm:$0xff] %v996_v13 }
 0x221 PF: > { %s18_s24 = sadd.s32 1, %s1296_s24  }
 0x222   : > { %p15_p4 = scmp.ge.s32.totalorder %s18_s24, 4  }
 0x224   :  { %17 = sbr.rel (!%p15_p4) target bundleno = 1 (0x1), region = 93 }

</bundles_post_ra>
